<compile_context>
chip_gen: v7x
topology: tpu7x:2x2x1
jax: 0.10.0
libtpu: 0.0.40
codegen_flags: <defaults>
</compile_context>

<pallas_src>
import math

import jax
import jax.numpy as jnp
from jax.experimental import pallas as pl
from jax.experimental.pallas import tpu as pltpu


def _round_up(x, m):
    return ((x + m - 1) // m) * m


# ----------------------------------------------------------------------------
# Kernel
# ----------------------------------------------------------------------------
def _fused_lstm_cell_kernel(x_ref, h_ref, c_ref, wx_ref, wh_ref, b_ref,
                            h_out_ref, c_out_ref):
    """One fused LSTM cell step (everything at lane-padded width Hp).

    x_ref  : (bb, D)       f32 input embeddings
    h_ref  : (bb, Hp)      f32 previous hidden (lanes >= H are zero)
    c_ref  : (bb, Hp)      f32 previous cell state (lanes >= H are zero)
    wx_ref : (D,  4*Hp)    pre-transposed, gate-lane-aligned W_ih (mxu dtype);
                           i/f/o columns pre-scaled by 0.5 (tanh-only sigmoid)
    wh_ref : (Hp, 4*Hp)    same for W_hh (padded rows are zero)
    b_ref  : (1,  4*Hp)    f32 folded bias (b_ih + b_hh), i/f/o pre-scaled
    outputs: (bb, Hp) f32 h_new, c_new (lane-dense, padded lanes stay zero)
    """
    Hp = c_ref.shape[-1]
    wdt = wx_ref.dtype

    # Two K-aligned MXU matmuls, f32 accumulate; f32 bias rides on the VPU.
    gates = jnp.dot(x_ref[...].astype(wdt), wx_ref[...],
                    preferred_element_type=jnp.float32)
    gates = gates + jnp.dot(h_ref[...].astype(wdt), wh_ref[...],
                            preferred_element_type=jnp.float32)
    gates = gates + b_ref[...]                                # (bb, 4*Hp) f32

    # One wide EUP pass over all four gates (i/f/o pre-scaled by 0.5 so that
    # sigmoid(z) = 0.5*tanh(z/2)+0.5 becomes a post-tanh affine fix-up).
    t = jnp.tanh(gates)

    i_g = 0.5 * t[:, 0 * Hp:1 * Hp] + 0.5
    f_g = 0.5 * t[:, 1 * Hp:2 * Hp] + 0.5
    g_g = t[:, 2 * Hp:3 * Hp]
    o_g = 0.5 * t[:, 3 * Hp:4 * Hp] + 0.5

    c_new = f_g * c_ref[...] + i_g * g_g                      # f32 cell update
    h_new = o_g * jnp.tanh(c_new)

    h_out_ref[...] = h_new
    c_out_ref[...] = c_new


# ----------------------------------------------------------------------------
# pallas_call wrapper
# ----------------------------------------------------------------------------
def _pick_block_b(batch):
    """Split the batch only where a second TensorCore exists (v7x)."""
    two_tc = False
    try:
        two_tc = "v7" in jax.devices()[0].device_kind.lower()
    except Exception:  # pragma: no cover - defensive; keep single block
        two_tc = False
    if two_tc and batch >= 256 and batch % 2 == 0 and (batch // 2) % 8 == 0:
        return batch // 2
    if batch >= 1024 and batch % 512 == 0:   # bound per-block VMEM on any gen
        return 512
    return batch


def lstm_step_pallas(x, h0p, c0p, w_x, w_h, b_f):
    """x (B,D) f32; h0p/c0p (B,Hp) f32; w_x (D,4Hp); w_h (Hp,4Hp); b_f (1,4Hp).

    Returns (h_new, c_new), each (B, Hp) float32 (lane-padded).
    """
    B, D = x.shape
    Hp = h0p.shape[-1]
    G4 = w_x.shape[-1]

    bb = _pick_block_b(B)
    nb = B // bb

    # VMEM budget from the actual block sizes (+ double-buffer headroom).
    block_bytes = (bb * D * 4 + 2 * bb * Hp * 4                 # x, h, c
                   + D * G4 * w_x.dtype.itemsize                # W_x
                   + Hp * G4 * w_h.dtype.itemsize               # W_h
                   + G4 * 4                                     # bias
                   + 2 * bb * Hp * 4)                           # outputs
    vmem_limit = int(min(112 << 20, max(32 << 20, 2.5 * block_bytes)))

    return pl.pallas_call(
        _fused_lstm_cell_kernel,
        out_shape=(jax.ShapeDtypeStruct((B, Hp), jnp.float32),
                   jax.ShapeDtypeStruct((B, Hp), jnp.float32)),
        grid=(nb,),
        in_specs=[
            pl.BlockSpec((bb, D), lambda i: (i, 0)),
            pl.BlockSpec((bb, Hp), lambda i: (i, 0)),
            pl.BlockSpec((bb, Hp), lambda i: (i, 0)),
            pl.BlockSpec((D, G4), lambda i: (0, 0)),
            pl.BlockSpec((Hp, G4), lambda i: (0, 0)),
            pl.BlockSpec((1, G4), lambda i: (0, 0)),
        ],
        out_specs=(pl.BlockSpec((bb, Hp), lambda i: (i, 0)),
                   pl.BlockSpec((bb, Hp), lambda i: (i, 0))),
        # Reuse the h0/c0 buffers in place for h_new/c_new.
        input_output_aliases={1: 0, 2: 1},
        compiler_params=pltpu.CompilerParams(
            dimension_semantics=("parallel",),
            vmem_limit_bytes=vmem_limit),
    )(x, h0p, c0p, w_x, w_h, b_f)


# ----------------------------------------------------------------------------
# Weight prep (done ONCE at init)
# ----------------------------------------------------------------------------
def build_lstm_operands(w_ih, w_hh, b_ih, b_hh, mxu_dtype=jnp.bfloat16,
                        lane_pad=128):
    """PyTorch (4H,D),(4H,H),(4H,),(4H,) -> W_x (D,4Hp), W_h (Hp,4Hp), b (1,4Hp).

    * Pre-transposed for the MXU; each gate's H columns start at lane g*Hp so
      all gate slices are 128-lane aligned; pad columns/rows are zero.
    * The 0.5 of sigmoid(z)=0.5*tanh(z/2)+0.5 is folded into the i/f/o gate
      columns (exact power-of-two scale), so the kernel needs only one tanh.
    * Weights are cast to mxu_dtype (bf16 default); the bias stays float32 and
      is added after the f32-accumulated matmuls.
    """
    four_h, D = w_ih.shape
    H = four_h // 4
    Hp = _round_up(H, lane_pad)

    w_ih = jnp.asarray(w_ih, jnp.float32)
    w_hh = jnp.asarray(w_hh, jnp.float32)
    bias = jnp.asarray(b_ih, jnp.float32) + jnp.asarray(b_hh, jnp.float32)
    gate_scale = (0.5, 0.5, 1.0, 0.5)   # i, f, g, o

    w_x = jnp.zeros((D, 4 * Hp), jnp.float32)
    w_h = jnp.zeros((Hp, 4 * Hp), jnp.float32)
    b_f = jnp.zeros((1, 4 * Hp), jnp.float32)
    for g in range(4):
        s = gate_scale[g]
        cols = slice(g * Hp, g * Hp + H)
        rows = slice(g * H, (g + 1) * H)
        w_x = w_x.at[:, cols].set(s * w_ih[rows, :].T)
        w_h = w_h.at[:H, cols].set(s * w_hh[rows, :].T)
        b_f = b_f.at[:, cols].set(s * bias[rows][None, :])
    return w_x.astype(mxu_dtype), w_h.astype(mxu_dtype), b_f


# ----------------------------------------------------------------------------
# Jitted forward step (pad + kernel + slice, all under one jit)
# ----------------------------------------------------------------------------
@jax.jit
def _incremental_lstm_forward(actions, h0, c0, w_x, w_h, b_f):
    """actions (B, D); h0/c0 (1, B, H); weight operands as built above."""
    H = h0.shape[-1]
    Hp = w_h.shape[0]

    x = actions.astype(jnp.float32)
    h = h0[0].astype(jnp.float32)
    c = c0[0].astype(jnp.float32)
    if Hp != H:
        pad = ((0, 0), (0, Hp - H))
        h = jnp.pad(h, pad)
        c = jnp.pad(c, pad)

    h_new_p, c_new_p = lstm_step_pallas(x, h, c, w_x, w_h, b_f)
    h_new = h_new_p[:, :H]
    c_new = c_new_p[:, :H]
    # lstm_out.view(B, -1) == h_new ; new hidden is (num_layers=1, B, H)
    return h_new, (h_new[None, :, :], c_new[None, :, :])


# ----------------------------------------------------------------------------
# Module
# ----------------------------------------------------------------------------
class IncrementalActionRecurrenceModulePallas:
    """JAX/Pallas port of the PyTorch module (num_layers=1 supported)."""

    def __init__(self, input_emb_dim, output_emb_dim, num_layers=1, key=None,
                 mxu_dtype=jnp.bfloat16):
        assert num_layers == 1, "only num_layers=1 implemented"
        self.input_emb_dim = input_emb_dim
        self.output_emb_dim = output_emb_dim
        self.num_layers = num_layers
        if key is None:
            key = jax.random.PRNGKey(0)
        k1, k2, k3, k4 = jax.random.split(key, 4)
        # PyTorch nn.LSTM default init: U(-1/sqrt(H), 1/sqrt(H)); gate order [i,f,g,o]
        bound = 1.0 / math.sqrt(output_emb_dim)
        H, D = output_emb_dim, input_emb_dim
        self.w_ih = jax.random.uniform(k1, (4 * H, D), jnp.float32, -bound, bound)
        self.w_hh = jax.random.uniform(k2, (4 * H, H), jnp.float32, -bound, bound)
        self.b_ih = jax.random.uniform(k3, (4 * H,), jnp.float32, -bound, bound)
        self.b_hh = jax.random.uniform(k4, (4 * H,), jnp.float32, -bound, bound)

        # All weight prep hoisted out of the per-call path: split, transposed,
        # lane-aligned, sigmoid-scale-folded operands.  bf16 weights by
        # default (half the dominant HBM bytes); bias/cell math stay f32.
        self.w_x, self.w_h, self.b_fused = build_lstm_operands(
            self.w_ih, self.w_hh, self.b_ih, self.b_hh, mxu_dtype=mxu_dtype)

        self._zero_cache = {}

    def _zero_hidden(self, batch_size):
        z = self._zero_cache.get(batch_size)
        if z is None:
            dims = (self.num_layers, batch_size, self.output_emb_dim)
            z = (jnp.zeros(dims, jnp.float32), jnp.zeros(dims, jnp.float32))
            self._zero_cache[batch_size] = z
        return z

    def forward(self, actions_batch, hidden_vectors=None):
        """actions_batch: (B, D); hidden_vectors: None or (h, c) each (1, B, H)."""
        b, d = actions_batch.shape
        assert d == self.input_emb_dim
        if hidden_vectors is None:
            hidden_vectors = self._zero_hidden(b)
        h0, c0 = hidden_vectors
        return _incremental_lstm_forward(actions_batch, h0, c0,
                                         self.w_x, self.w_h, self.b_fused)

    __call__ = forward


# ----------------------------------------------------------------------------
# Pure-JAX reference of the PyTorch LSTM cell semantics
# ----------------------------------------------------------------------------
def _reference_lstm_step(x, h0, c0, w_ih, w_hh, b_ih, b_hh):
    gates = x @ w_ih.T + b_ih + h0 @ w_hh.T + b_hh
    H = h0.shape[1]
    i = jax.nn.sigmoid(gates[:, 0 * H:1 * H])
    f = jax.nn.sigmoid(gates[:, 1 * H:2 * H])
    g = jnp.tanh(gates[:, 2 * H:3 * H])
    o = jax.nn.sigmoid(gates[:, 3 * H:4 * H])
    c_new = f * c0 + i * g
    h_new = o * jnp.tanh(c_new)
    return h_new, c_new


if __name__ == "__main__":
    key = jax.random.PRNGKey(0)
    k_param, k_x, k_h, k_c = jax.random.split(key, 4)

    B = 2      # batch
    D = 32     # input_emb_dim
    H = 32     # output_emb_dim

    # Same key -> identical weights; one bf16 (default) and one f32 instance.
    module_bf16 = IncrementalActionRecurrenceModulePallas(D, H, key=k_param)
    module_f32 = IncrementalActionRecurrenceModulePallas(
        D, H, key=k_param, mxu_dtype=jnp.float32)

    actions = jax.random.normal(k_x, (B, D), jnp.float32)
    h0 = jax.random.normal(k_h, (1, B, H), jnp.float32)
    c0 = jax.random.normal(k_c, (1, B, H), jnp.float32)

    # Run both paths (provided hidden state, and hidden_vectors=None).
    out32, (h32, c32) = module_f32.forward(actions, (h0, c0))
    out32_0, _ = module_f32.forward(actions, None)
    out16, (h16, c16) = module_bf16.forward(actions, (h0, c0))
    jax.block_until_ready((out32, h32, c32, out32_0, out16, h16, c16))

    # Correctness checks against a pure-JAX reference of the PyTorch LSTM cell
    h_ref, c_ref = _reference_lstm_step(
        actions, h0[0], c0[0],
        module_f32.w_ih, module_f32.w_hh, module_f32.b_ih, module_f32.b_hh)
    h_ref0, _ = _reference_lstm_step(
        actions, jnp.zeros((B, H), jnp.float32), jnp.zeros((B, H), jnp.float32),
        module_f32.w_ih, module_f32.w_hh, module_f32.b_ih, module_f32.b_hh)

    assert out32.shape == (B, H)
    assert h32.shape == (1, B, H) and c32.shape == (1, B, H)

    # f32 weights: exact parity with the reference.
    assert jnp.allclose(out32, h_ref, atol=2e-5, rtol=2e-5)
    assert jnp.allclose(h32[0], h_ref, atol=2e-5, rtol=2e-5)
    assert jnp.allclose(c32[0], c_ref, atol=2e-5, rtol=2e-5)
    assert jnp.allclose(out32_0, h_ref0, atol=2e-5, rtol=2e-5)

    # bf16 weights (default): matmul-operand quantization only -> loose tol.
    assert jnp.allclose(out16, h_ref, atol=2e-2, rtol=2e-2)
    assert jnp.allclose(c16[0], c_ref, atol=2e-2, rtol=2e-2)

    print("KERNEL_OK")
</pallas_src>

<mosaic_0001>
module attributes {stable_mosaic.version = 11 : i64} {
  func.func @_fused_lstm_cell_kernel(%arg0: i32, %arg1: memref<2x32xf32, #tpu.memory_space<vmem>>, %arg2: memref<2x128xf32, #tpu.memory_space<vmem>>, %arg3: memref<2x128xf32, #tpu.memory_space<vmem>>, %arg4: memref<32x512xf32, #tpu.memory_space<vmem>>, %arg5: memref<128x512xf32, #tpu.memory_space<vmem>>, %arg6: memref<1x512xf32, #tpu.memory_space<vmem>>, %arg7: memref<2x128xf32, #tpu.memory_space<vmem>>, %arg8: memref<2x128xf32, #tpu.memory_space<vmem>>) attributes {dimension_semantics = [#tpu.dimension_semantics<parallel>], iteration_bounds = array<i64: 1>, scalar_prefetch = 0 : i64, scratch_operands = 0 : i64, tpu.core_type = #tpu.core_type<tc>, window_params = [{transform_indices = @transform_0, window_bounds = array<i64: 2, 32>}, {transform_indices = @transform_1, window_bounds = array<i64: 2, 128>}, {transform_indices = @transform_2, window_bounds = array<i64: 2, 128>}, {pipeline_mode = #tpu.pipeline_mode<synchronous>, transform_indices = @transform_3, window_bounds = array<i64: 32, 512>}, {pipeline_mode = #tpu.pipeline_mode<synchronous>, transform_indices = @transform_4, window_bounds = array<i64: 128, 512>}, {pipeline_mode = #tpu.pipeline_mode<synchronous>, transform_indices = @transform_5, window_bounds = array<i64: 1, 512>}, {transform_indices = @transform_6, window_bounds = array<i64: 2, 128>}, {transform_indices = @transform_7, window_bounds = array<i64: 2, 128>}]} {
    %c0 = arith.constant 0 : index
    %c0_0 = arith.constant 0 : index
    %0 = vector.load %arg1[%c0, %c0_0] : memref<2x32xf32, #tpu.memory_space<vmem>>, vector<2x32xf32>
    %c0_1 = arith.constant 0 : index
    %c0_2 = arith.constant 0 : index
    %1 = vector.load %arg4[%c0_1, %c0_2] : memref<32x512xf32, #tpu.memory_space<vmem>>, vector<32x512xf32>
    %cst = arith.constant dense<0.000000e+00> : vector<2x512xf32>
    %2 = tpu.matmul %0, %1, %cst {dimension_numbers = #tpu.dot_dimension_numbers<[1], [0], [0], [1], [0, 0, 1, 1], [], []>} : vector<2x32xf32>, vector<32x512xf32>, vector<2x512xf32> -> vector<2x512xf32>
    %c0_3 = arith.constant 0 : index
    %c0_4 = arith.constant 0 : index
    %3 = vector.load %arg2[%c0_3, %c0_4] : memref<2x128xf32, #tpu.memory_space<vmem>>, vector<2x128xf32>
    %c0_5 = arith.constant 0 : index
    %c0_6 = arith.constant 0 : index
    %4 = vector.load %arg5[%c0_5, %c0_6] : memref<128x512xf32, #tpu.memory_space<vmem>>, vector<128x512xf32>
    %cst_7 = arith.constant dense<0.000000e+00> : vector<2x512xf32>
    %5 = tpu.matmul %3, %4, %cst_7 {dimension_numbers = #tpu.dot_dimension_numbers<[1], [0], [0], [1], [0, 0, 1, 1], [], []>} : vector<2x128xf32>, vector<128x512xf32>, vector<2x512xf32> -> vector<2x512xf32>
    %6 = arith.addf %2, %5 : vector<2x512xf32>
    %c0_8 = arith.constant 0 : index
    %c0_9 = arith.constant 0 : index
    %7 = vector.load %arg6[%c0_8, %c0_9] : memref<1x512xf32, #tpu.memory_space<vmem>>, vector<1x512xf32>
    %8 = vector.broadcast %7 : vector<1x512xf32> to vector<2x512xf32>
    %9 = arith.addf %6, %8 : vector<2x512xf32>
    %10 = math.tanh %9 : vector<2x512xf32>
    %11 = vector.extract_strided_slice %10 {offsets = [0, 0], sizes = [2, 128], strides = [1, 1]} : vector<2x512xf32> to vector<2x128xf32>
    %cst_10 = arith.constant 5.000000e-01 : f32
    %12 = vector.broadcast %cst_10 : f32 to vector<2x128xf32>
    %13 = arith.mulf %12, %11 : vector<2x128xf32>
    %cst_11 = arith.constant 5.000000e-01 : f32
    %14 = vector.broadcast %cst_11 : f32 to vector<2x128xf32>
    %15 = arith.addf %13, %14 : vector<2x128xf32>
    %16 = vector.extract_strided_slice %10 {offsets = [0, 128], sizes = [2, 128], strides = [1, 1]} : vector<2x512xf32> to vector<2x128xf32>
    %cst_12 = arith.constant 5.000000e-01 : f32
    %17 = vector.broadcast %cst_12 : f32 to vector<2x128xf32>
    %18 = arith.mulf %17, %16 : vector<2x128xf32>
    %cst_13 = arith.constant 5.000000e-01 : f32
    %19 = vector.broadcast %cst_13 : f32 to vector<2x128xf32>
    %20 = arith.addf %18, %19 : vector<2x128xf32>
    %21 = vector.extract_strided_slice %10 {offsets = [0, 256], sizes = [2, 128], strides = [1, 1]} : vector<2x512xf32> to vector<2x128xf32>
    %22 = vector.extract_strided_slice %10 {offsets = [0, 384], sizes = [2, 128], strides = [1, 1]} : vector<2x512xf32> to vector<2x128xf32>
    %cst_14 = arith.constant 5.000000e-01 : f32
    %23 = vector.broadcast %cst_14 : f32 to vector<2x128xf32>
    %24 = arith.mulf %23, %22 : vector<2x128xf32>
    %cst_15 = arith.constant 5.000000e-01 : f32
    %25 = vector.broadcast %cst_15 : f32 to vector<2x128xf32>
    %26 = arith.addf %24, %25 : vector<2x128xf32>
    %c0_16 = arith.constant 0 : index
    %c0_17 = arith.constant 0 : index
    %27 = vector.load %arg3[%c0_16, %c0_17] : memref<2x128xf32, #tpu.memory_space<vmem>>, vector<2x128xf32>
    %28 = arith.mulf %20, %27 : vector<2x128xf32>
    %29 = arith.mulf %15, %21 : vector<2x128xf32>
    %30 = arith.addf %28, %29 : vector<2x128xf32>
    %31 = math.tanh %30 : vector<2x128xf32>
    %32 = arith.mulf %26, %31 : vector<2x128xf32>
    %c0_18 = arith.constant 0 : index
    %c0_19 = arith.constant 0 : index
    %33 = vector.load %arg7[%c0_18, %c0_19] : memref<2x128xf32, #tpu.memory_space<vmem>>, vector<2x128xf32>
    tpu.vector_store %arg7[%c0_18, %c0_19], %32 {strides = array<i32>} : memref<2x128xf32, #tpu.memory_space<vmem>>, vector<2x128xf32>,
    %c0_20 = arith.constant 0 : index
    %c0_21 = arith.constant 0 : index
    %34 = vector.load %arg8[%c0_20, %c0_21] : memref<2x128xf32, #tpu.memory_space<vmem>>, vector<2x128xf32>
    tpu.vector_store %arg8[%c0_20, %c0_21], %30 {strides = array<i32>} : memref<2x128xf32, #tpu.memory_space<vmem>>, vector<2x128xf32>,
    return
  }
  func.func @transform_0(%arg0: i32) -> (i32, i32) {
    %c0_i32 = arith.constant 0 : i32
    %c0_i32_0 = arith.constant 0 : i32
    return %arg0, %c0_i32 : i32, i32
  }
  func.func @transform_1(%arg0: i32) -> (i32, i32) {
    %c0_i32 = arith.constant 0 : i32
    %c0_i32_0 = arith.constant 0 : i32
    return %arg0, %c0_i32 : i32, i32
  }
  func.func @transform_2(%arg0: i32) -> (i32, i32) {
    %c0_i32 = arith.constant 0 : i32
    %c0_i32_0 = arith.constant 0 : i32
    return %arg0, %c0_i32 : i32, i32
  }
  func.func @transform_3(%arg0: i32) -> (i32, i32) {
    %c0_i32 = arith.constant 0 : i32
    %c0_i32_0 = arith.constant 0 : i32
    %c0_i32_1 = arith.constant 0 : i32
    return %c0_i32, %c0_i32_0 : i32, i32
  }
  func.func @transform_4(%arg0: i32) -> (i32, i32) {
    %c0_i32 = arith.constant 0 : i32
    %c0_i32_0 = arith.constant 0 : i32
    %c0_i32_1 = arith.constant 0 : i32
    return %c0_i32, %c0_i32_0 : i32, i32
  }
  func.func @transform_5(%arg0: i32) -> (i32, i32) {
    %c0_i32 = arith.constant 0 : i32
    %c0_i32_0 = arith.constant 0 : i32
    %c0_i32_1 = arith.constant 0 : i32
    return %c0_i32, %c0_i32_0 : i32, i32
  }
  func.func @transform_6(%arg0: i32) -> (i32, i32) {
    %c0_i32 = arith.constant 0 : i32
    %c0_i32_0 = arith.constant 0 : i32
    return %arg0, %c0_i32 : i32, i32
  }
  func.func @transform_7(%arg0: i32) -> (i32, i32) {
    %c0_i32 = arith.constant 0 : i32
    %c0_i32_0 = arith.constant 0 : i32
    return %arg0, %c0_i32 : i32, i32
  }
}

</mosaic_0001>

<bundles_post_ra>
// kernel: _incremental_lstm_forward.1
= control target key start
LH: loop header
LB: loop body
LE: loop exit
PB: predicated region body
PF: predicated region fallthrough
CT: control target
= control target key end

     0   :  { %13 = vsyncpa [#allocation3], 0  ;;  %s717_s0 = inlined_call_operand.vmem [shape: f32[2,32], index: 0, kind: input, shape index: {}]   ;;  %s718_s1 = inlined_call_operand.vmem [shape: f32[2,128], index: 1, kind: input, shape index: {}, may-alias: {1,6}]   ;;  %s719_s2 = inlined_call_operand.vmem [shape: f32[2,128], index: 2, kind: input, shape index: {}, may-alias: {2,7}]   ;;  %s720_s3 = inlined_call_operand.hbm [shape: f32[32,512], index: 3, kind: input, shape index: {}]   ;;  %s721_s4 = inlined_call_operand.hbm [shape: f32[128,512], index: 4, kind: input, shape index: {}]   ;;  %s722_s5 = inlined_call_operand.vmem [shape: f32[1,512], index: 5, kind: input, shape index: {}]   ;;  %s723_s6 = inlined_call_operand.vmem [shape: f32[2,128], index: 6, kind: output, shape index: {0}, may-alias: {1,6}]   ;;  %s724_s7 = inlined_call_operand.vmem [shape: f32[2,128], index: 7, kind: output, shape index: {1}, may-alias: {2,7}]  }
   0x1   :  { %14 = vsyncpa [#allocation5], 0  ;;  %s626_s24 = smov [#allocation2]   ;;  %s578_s28 = scalar_lea.hbm %s720_s3, 2048 }
   0x2   :  { %s26_s25 = sshll.u32 %s626_s24, 4  ;;  %p579_p0 = scmp.ne.s32.totalorder %s720_s3, %s578_s28  ;;  %s27_s25 = int_to_ptr.vmem [resolvable:$true] %s26_s25 }
   0x3   :  { %p582_p1 = scmp.lt.u32.totalorder %s578_s28, %s720_s3 }
   0x5   :  { %p584_p2 = pnand %p582_p1, %p579_p0 }
   0x7   :  { %587 = shalt.err (!%p584_p2)
}
   0x8   :  { %s588_s10 = scalar_lea.vmem %s27_s25, 2048  ;;  %p593_p4 = scmp.lt.s32.totalorder %s27_s25, %s27_s25 }
   0x9   :  { %p589_p3 = scmp.ne.s32.totalorder %s27_s25, %s588_s10  ;;  %p594_p5 = scmp.lt.s32.totalorder %s588_s10, %s588_s10 }
   0xb   :  { %p595_p6 = por %p594_p5, %p593_p4 }
   0xd   :  { %p596_p7 = pnand %p595_p6, %p589_p3 }
   0xf   :  { %599 = shalt.err (!%p596_p7)
}
  0x10   :  { %s627_s11 = smov 512   ;;  %s628_s12 = smov 32  }
  0x11   :  { %32 = dma.hbm_to_vmem [thread:$0]  %s720_s3, 2048, %s27_s25, [#allocation3], %s627_s11, %s627_s11, %s628_s12  }
  0x12   :  { %s629_s15 = smov [#allocation4]   ;;  %s600_s19 = scalar_lea.hbm %s721_s4, 8192 }
  0x13   :  { %s38_s16 = sshll.u32 %s629_s15, 4  ;;  %p601_p8 = scmp.ne.s32.totalorder %s721_s4, %s600_s19  ;;  %s39_s16 = int_to_ptr.vmem [resolvable:$true] %s38_s16 }
  0x14   :  { %p604_p9 = scmp.lt.u32.totalorder %s600_s19, %s721_s4 }
  0x16   :  { %p606_p10 = pnand %p604_p9, %p601_p8 }
  0x18   :  { %609 = shalt.err (!%p606_p10)
}
  0x19   :  { %s610_s24 = scalar_lea.vmem %s39_s16, 8192  ;;  %p615_p12 = scmp.lt.s32.totalorder %s39_s16, %s39_s16 }
  0x1a   :  { %p611_p11 = scmp.ne.s32.totalorder %s39_s16, %s610_s24  ;;  %p616_p13 = scmp.lt.s32.totalorder %s610_s24, %s610_s24 }
  0x1c   :  { %p617_p0 = por %p616_p13, %p615_p12 }
  0x1e   :  { %p618_p1 = pnand %p617_p0, %p611_p11 }
  0x20   :  { %621 = shalt.err (!%p618_p1)
}
  0x21   :  { %44 = dma.hbm_to_vmem [thread:$0]  %s721_s4, 8192, %s39_s16, [#allocation5], %s627_s11, %s627_s11, %s628_s12  }
  0x22   :  { %622 = dma.done.wait [#allocation3], 2048  }
  0x23   :  { %623 = vsyncadd [#allocation3], 4294965248 }
  0x24   :  { %624 = dma.done.wait [#allocation5], 8192  }
  0x25   :  { %625 = vsyncadd [#allocation5], 4294959104  ;;  %v630_v0 = vmov 0.0   ;;  %v72_v1 = vld [vmem:[#allocation4 + $0x8] sm:$0xff]  ;;  %v74_v3 = vld [vmem:[#allocation4 + $0x18] sm:$0xff]  ;;  %vm277_vm0 = vcmask 261120  }
  0x26   :  { %199 = vmatprep.mubr.f32.mxu0 %v630_v0  ;;  %270 = vmatprep.mubr.f32.mxu1 %v630_v0  ;;  %v76_v2 = vld [vmem:[#allocation4 + $0x28] sm:$0xff]  ;;  %v78_v5 = vld [vmem:[#allocation4 + $0x38] sm:$0xff]  ;;  %v71_v6 = vld [vmem:[#allocation4] sm:$0xff] }
  0x27   :  { %v479_v4 = vpack.c.bf16 %v76_v2, %v72_v1  ;;  %v75_v7 = vld [vmem:[#allocation4 + $0x20] sm:$0xff]  ;;  %v511_v8 = vpack.c.bf16 %v78_v5, %v74_v3  ;;  %v73_v10 = vld [vmem:[#allocation4 + $0x10] sm:$0xff]  ;;  %v80_v12 = vld [vmem:[#allocation4 + $0x48] sm:$0xff] }
  0x28   :  { %v481_v9 = vpack.c.bf16 %v75_v7, %v71_v6  ;;  %v77_v11 = vld [vmem:[#allocation4 + $0x30] sm:$0xff]  ;;  %v84_v14 = vld [vmem:[#allocation4 + $0x68] sm:$0xff]  ;;  %v82_v15 = vld [vmem:[#allocation4 + $0x58] sm:$0xff] }
  0x29   :  { %480 = vmatprep.subr.bf16.mxu0 %v479_v4  ;;  %v513_v13 = vpack.c.bf16 %v77_v11, %v73_v10  ;;  %v86_v16 = vld [vmem:[#allocation4 + $0x78] sm:$0xff]  ;;  %512 = vmatprep.subr.bf16.mxu1 %v511_v8  ;;  %v483_v17 = vpack.c.bf16 %v84_v14, %v80_v12  ;;  %v79_v19 = vld [vmem:[#allocation4 + $0x40] sm:$0xff]  ;;  %v81_v21 = vld [vmem:[#allocation4 + $0x50] sm:$0xff] }
  0x2a   :  { %482 = vmatpush1.bf16.msra.mxu0 %v481_v9  ;;  %v515_v18 = vpack.c.bf16 %v86_v16, %v82_v15  ;;  %v83_v20 = vld [vmem:[#allocation4 + $0x60] sm:$0xff]  ;;  %v85_v23 = vld [vmem:[#allocation4 + $0x70] sm:$0xff]  ;;  %v88_v24 = vld [vmem:[#allocation4 + $0x88] sm:$0xff] }
  0x2b   :  { %514 = vmatpush1.bf16.msra.mxu1 %v513_v13  ;;  %v485_v22 = vpack.c.bf16 %v83_v20, %v79_v19  ;;  %v92_v25 = vld [vmem:[#allocation4 + $0xa8] sm:$0xff]  ;;  %484 = vmatprep.subr.bf16.mxu0 %v483_v17  ;;  %v517_v26 = vpack.c.bf16 %v85_v23, %v81_v21  ;;  %v90_v28 = vld [vmem:[#allocation4 + $0x98] sm:$0xff]  ;;  %v87_v30 = vld [vmem:[#allocation4 + $0x80] sm:$0xff] }
  0x2c   :  { %516 = vmatprep.subr.bf16.mxu1 %v515_v18  ;;  %v487_v27 = vpack.c.bf16 %v92_v25, %v88_v24  ;;  %v94_v29 = vld [vmem:[#allocation4 + $0xb8] sm:$0xff]  ;;  %v91_v32 = vld [vmem:[#allocation4 + $0xa0] sm:$0xff]  ;;  %v89_v33 = vld [vmem:[#allocation4 + $0x90] sm:$0xff] }
  0x2d   :  { %v519_v31 = vpack.c.bf16 %v94_v29, %v90_v28  ;;  %v93_v34 = vld [vmem:[#allocation4 + $0xb0] sm:$0xff]  ;;  %v489_v35 = vpack.c.bf16 %v91_v32, %v87_v30  ;;  %v96_v36 = vld [vmem:[#allocation4 + $0xc8] sm:$0xff]  ;;  %v98_v38 = vld [vmem:[#allocation4 + $0xd8] sm:$0xff] }
  0x2e   :  { %486 = vmatpush1.bf16.msra.mxu0 %v485_v22  ;;  %v100_v37 = vld [vmem:[#allocation4 + $0xe8] sm:$0xff]  ;;  %v521_v39 = vpack.c.bf16 %v93_v34, %v89_v33  ;;  %v102_v41 = vld [vmem:[#allocation4 + $0xf8] sm:$0xff]  ;;  %v95_v42 = vld [vmem:[#allocation4 + $0xc0] sm:$0xff] }
  0x2f   :  { %518 = vmatpush1.bf16.msra.mxu1 %v517_v26  ;;  %488 = vmatprep.subr.bf16.mxu0 %v487_v27  ;;  %v491_v40 = vpack.c.bf16 %v100_v37, %v96_v36  ;;  %v99_v43 = vld [vmem:[#allocation4 + $0xe0] sm:$0xff]  ;;  %v523_v44 = vpack.c.bf16 %v102_v41, %v98_v38  ;;  %v97_v45 = vld [vmem:[#allocation4 + $0xd0] sm:$0xff]  ;;  %v104_v47 = vld [vmem:[#allocation4 + $0x108] sm:$0xff] }
  0x30   :  { %520 = vmatprep.subr.bf16.mxu1 %v519_v31  ;;  %v101_v46 = vld [vmem:[#allocation4 + $0xf0] sm:$0xff]  ;;  %v108_v48 = vld [vmem:[#allocation4 + $0x128] sm:$0xff]  ;;  %v106_v49 = vld [vmem:[#allocation4 + $0x118] sm:$0xff]  ;;  %v493_v51 = vpack.c.bf16 %v99_v43, %v95_v42 }
  0x31   :  { %v110_v50 = vld [vmem:[#allocation4 + $0x138] sm:$0xff]  ;;  %v525_v52 = vpack.c.bf16 %v101_v46, %v97_v45  ;;  %v495_v53 = vpack.c.bf16 %v108_v48, %v104_v47  ;;  %v103_v54 = vld [vmem:[#allocation4 + $0x100] sm:$0xff]  ;;  %v105_v56 = vld [vmem:[#allocation4 + $0x110] sm:$0xff] }
  0x32   :  { %490 = vmatpush1.bf16.msra.mxu0 %v489_v35  ;;  %v107_v55 = vld [vmem:[#allocation4 + $0x120] sm:$0xff]  ;;  %v527_v57 = vpack.c.bf16 %v110_v50, %v106_v49  ;;  %v109_v58 = vld [vmem:[#allocation4 + $0x130] sm:$0xff]  ;;  %v112_v59 = vld [vmem:[#allocation4 + $0x148] sm:$0xff] }
  0x33   :  { %522 = vmatpush1.bf16.msra.mxu1 %v521_v39  ;;  %492 = vmatprep.subr.bf16.mxu0 %v491_v40  ;;  %v116_v60 = vld [vmem:[#allocation4 + $0x168] sm:$0xff]  ;;  %v114_v61 = vld [vmem:[#allocation4 + $0x158] sm:$0xff]  ;;  %v497_v63 = vpack.c.bf16 %v107_v55, %v103_v54  ;;  %v529_v1 = vpack.c.bf16 %v109_v58, %v105_v56  ;;  %v111_v3 = vld [vmem:[#allocation4 + $0x140] sm:$0xff] }
  0x34   :  { %524 = vmatprep.subr.bf16.mxu1 %v523_v44  ;;  %v118_v62 = vld [vmem:[#allocation4 + $0x178] sm:$0xff]  ;;  %v499_v2 = vpack.c.bf16 %v116_v60, %v112_v59  ;;  %v115_v4 = vld [vmem:[#allocation4 + $0x160] sm:$0xff]  ;;  %v113_v5 = vld [vmem:[#allocation4 + $0x150] sm:$0xff]  ;;  %v425_v60 = vlaneseq }
  0x35   :  { %v531_v6 = vpack.c.bf16 %v118_v62, %v114_v61  ;;  %v117_v7 = vld [vmem:[#allocation4 + $0x170] sm:$0xff]  ;;  %v120_v8 = vld [vmem:[#allocation4 + $0x188] sm:$0xff]  ;;  %v122_v10 = vld [vmem:[#allocation4 + $0x198] sm:$0xff]  ;;  %v501_v12 = vpack.c.bf16 %v115_v4, %v111_v3 }
  0x36   :  { %494 = vmatpush1.bf16.msra.mxu0 %v493_v51  ;;  %v124_v9 = vld [vmem:[#allocation4 + $0x1a8] sm:$0xff]  ;;  %v126_v11 = vld [vmem:[#allocation4 + $0x1b8] sm:$0xff]  ;;  %v533_v13 = vpack.c.bf16 %v117_v7, %v113_v5  ;;  %v119_v15 = vld [vmem:[#allocation4 + $0x180] sm:$0xff]  ;;  %v426_v61 = vshrl.u32 %v425_v60, 7 }
  0x37   :  { %526 = vmatpush1.bf16.msra.mxu1 %v525_v52  ;;  %496 = vmatprep.subr.bf16.mxu0 %v495_v53  ;;  %v503_v14 = vpack.c.bf16 %v124_v9, %v120_v8  ;;  %v123_v16 = vld [vmem:[#allocation4 + $0x1a0] sm:$0xff]  ;;  %v121_v17 = vld [vmem:[#allocation4 + $0x190] sm:$0xff]  ;;  %v535_v18 = vpack.c.bf16 %v126_v11, %v122_v10  ;;  %v128_v20 = vld [vmem:[#allocation4 + $0x1c8] sm:$0xff] }
  0x38   :  { %528 = vmatprep.subr.bf16.mxu1 %v527_v57  ;;  %v125_v19 = vld [vmem:[#allocation4 + $0x1b0] sm:$0xff]  ;;  %v132_v21 = vld [vmem:[#allocation4 + $0x1e8] sm:$0xff]  ;;  %v130_v22 = vld [vmem:[#allocation4 + $0x1d8] sm:$0xff]  ;;  %v505_v24 = vpack.c.bf16 %v123_v16, %v119_v15  ;;  %v427_v62 = vsub.s32 0, %v426_v61 }
  0x39   :  { %v134_v23 = vld [vmem:[#allocation4 + $0x1f8] sm:$0xff]  ;;  %v537_v25 = vpack.c.bf16 %v125_v19, %v121_v17  ;;  %v507_v26 = vpack.c.bf16 %v132_v21, %v128_v20  ;;  %v127_v27 = vld [vmem:[#allocation4 + $0x1c0] sm:$0xff]  ;;  %v129_v29 = vld [vmem:[#allocation4 + $0x1d0] sm:$0xff] }
  0x3a   :  { %498 = vmatpush1.bf16.msra.mxu0 %v497_v63  ;;  %v131_v28 = vld [vmem:[#allocation4 + $0x1e0] sm:$0xff]  ;;  %v539_v30 = vpack.c.bf16 %v134_v23, %v130_v22  ;;  %v133_v31 = vld [vmem:[#allocation4 + $0x1f0] sm:$0xff]  ;;  %v55_v32 = vld [vmem:[#allocation2 + $0x8] sm:$0xff] }
  0x3b   :  { %530 = vmatpush1.bf16.msra.mxu1 %v529_v1  ;;  %500 = vmatprep.subr.bf16.mxu0 %v499_v2  ;;  %v59_v33 = vld [vmem:[#allocation2 + $0x28] sm:$0xff]  ;;  %v57_v34 = vld [vmem:[#allocation2 + $0x18] sm:$0xff]  ;;  %v509_v36 = vpack.c.bf16 %v131_v28, %v127_v27  ;;  %v541_v37 = vpack.c.bf16 %v133_v31, %v129_v29  ;;  %v54_v39 = vld [vmem:[#allocation2] sm:$0xff]  ;;  %v431_v1 = vsub.s32 1, %v426_v61  ;;  %v435_v2 = vsub.s32 2, %v426_v61 }
  0x3c   :  { %532 = vmatprep.subr.bf16.mxu1 %v531_v6  ;;  %v61_v35 = vld [vmem:[#allocation2 + $0x38] sm:$0xff]  ;;  %v543_v38 = vpack.c.bf16 %v59_v33, %v55_v32  ;;  %v58_v40 = vld [vmem:[#allocation2 + $0x20] sm:$0xff]  ;;  %v56_v41 = vld [vmem:[#allocation2 + $0x10] sm:$0xff] }
  0x3d   :  { %v551_v42 = vpack.c.bf16 %v61_v35, %v57_v34  ;;  %v60_v43 = vld [vmem:[#allocation2 + $0x30] sm:$0xff]  ;;  %v63_v44 = vld [vmem:[#allocation2 + $0x48] sm:$0xff]  ;;  %v65_v46 = vld [vmem:[#allocation2 + $0x58] sm:$0xff]  ;;  %v545_v49 = vpack.c.bf16 %v58_v40, %v54_v39 }
  0x3e   :  { %502 = vmatpush1.bf16.msra.mxu0 %v501_v12  ;;  %v67_v45 = vld [vmem:[#allocation2 + $0x68] sm:$0xff]  ;;  %v69_v47 = vld [vmem:[#allocation2 + $0x78] sm:$0xff]  ;;  %v70_v48 = vld [vmem:[%s718_s1] sm:$0x3]  ;;  %v553_v50 = vpack.c.bf16 %v60_v43, %v56_v41  ;;  %v439_v12 = vsub.s32 3, %v426_v61 }
  0x3f   :  { %534 = vmatpush1.bf16.msra.mxu1 %v533_v13  ;;  %504 = vmatprep.subr.bf16.mxu0 %v503_v14  ;;  %v547_v51 = vpack.c.bf16 %v67_v45, %v63_v44  ;;  %v62_v52 = vld [vmem:[#allocation2 + $0x40] sm:$0xff]  ;;  %v555_v54 = vpack.c.bf16 %v69_v47, %v65_v46  ;;  %v64_v55 = vld [vmem:[#allocation2 + $0x50] sm:$0xff] }
  0x40   :  { %536 = vmatprep.subr.bf16.mxu1 %v535_v18  ;;  %v66_v53 = vld [vmem:[#allocation2 + $0x60] sm:$0xff]  ;;  %v68_v56 = vld [vmem:[#allocation2 + $0x70] sm:$0xff] }
  0x41   :  { %v549_v57 = vpack.c.bf16 %v66_v53, %v62_v52  ;;  %v557_v58 = vpack.c.bf16 %v68_v56, %v64_v55  ;;  %v53_v59 = vld [vmem:[%s717_s0] sm:$0x3] }
  0x42   :  { %506 = vmatpush1.bf16.msra.mxu0 %v505_v24  ;;  %v423_v63 = vld [vmem:[%s722_s5] sm:$0xf] }
  0x43   :  { %538 = vmatpush1.bf16.msra.mxu1 %v537_v25  ;;  %508 = vmatprep.subr.bf16.mxu0 %v507_v26  ;;  %v428_v3 = vrot.slane %v423_v63, %v427_v62  ;;  %v436_v4 = vrot.slane %v423_v63, %v435_v2  ;;  %v440_v13 = vrot.slane %v423_v63, %v439_v12  ;;  %v459_v21 = vld [vmem:[%s719_s2] sm:$0x3] }
  0x44   :  { %540 = vmatprep.subr.bf16.mxu1 %v539_v30 }
  0x46   :  { %510 = vmatpush1.bf16.msra.mxu0 %v509_v36 }
  0x47   :  { %542 = vmatpush1.bf16.msra.mxu1 %v541_v37  ;;  %544 = vmatprep.subr.bf16.mxu0 %v543_v38 }
  0x48   :  { %552 = vmatprep.subr.bf16.mxu1 %v551_v42 }
  0x49   :  { %200 = vmatmul.mubr.f32.vlgmr.msra.gmra.mrb[0].mxu0 %v70_v48 }
  0x4a   :  { %271 = vmatmul.mubr.f32.vlgmr.msra.gmra.mrb[0].mxu1 %v70_v48  ;;  %546 = vmatpush1.bf16.msra.mxu0 %v545_v49 }
  0x4b   :  { %554 = vmatpush1.bf16.msra.mxu1 %v553_v50  ;;  %548 = vmatprep.subr.bf16.mxu0 %v547_v51 }
  0x4c   :  { %556 = vmatprep.subr.bf16.mxu1 %v555_v54  ;;  %345 = vmatprep.mubr.f32.mxu0 %v630_v0 }
  0x4d   :  { %416 = vmatprep.mubr.f32.mxu1 %v630_v0  ;;  %v432_v0 = vrot.slane %v423_v63, %v431_v1 }
  0x4e   :  { %550 = vmatpush1.bf16.msra.mxu0 %v549_v57 }
  0x4f   :  { %558 = vmatpush1.bf16.msra.mxu1 %v557_v58 }
  0x51   :  { %477 = vmatmul.mubr.msk.f32.vlgmr.msra.gmra.mrb[0].mxu0 %vm277_vm0, %v53_v59 }
  0x52   :  { %478 = vmatmul.mubr.msk.f32.vlgmr.msra.gmra.mrb[0].mxu1 %vm277_vm0, %v53_v59 }
 0x124   :  { %v347_v5 = vpop.f32.mrb[0].mxu0 }
 0x125   :  { %v445_v6 = vadd.f32 %v428_v3, %v347_v5  ;;  %v418_v7 = vpop.f32.mrb[0].mxu1  ;;  %v349_v8 = vpop.f32.mrb[1].mxu0 }
 0x126   :  { %v446_v9 = vadd.f32 %v432_v0, %v349_v8  ;;  %v420_v10 = vpop.f32.mrb[1].mxu1  ;;  %v447_v11 = vadd.f32 %v436_v4, %v418_v7 }
 0x127   :  { %568 = vtanh.f32 %v445_v6  ;;  %v448_v14 = vadd.f32 %v440_v13, %v420_v10 }
 0x128   :  { %570 = vtanh.f32 %v446_v9 }
 0x129   :  { %572 = vtanh.f32 %v447_v11 }
 0x12a   :  { %574 = vtanh.f32 %v448_v14 }
 0x131   :  { %v569_v15 = vpop.eup %568 }
 0x132   :  { %v453_v16 = vmul.f32 0.5, %v569_v15  ;;  %v571_v17 = vpop.eup %570 }
 0x133   :  { %v455_v19 = vmul.f32 0.5, %v571_v17  ;;  %v573_v20 = vpop.eup %572 }
 0x134   :  { %v454_v18 = vadd.f32 0.5, %v453_v16  ;;  %v575_v26 = vpop.eup %574 }
 0x135   :  { %v456_v22 = vadd.f32 0.5, %v455_v19  ;;  %v457_v27 = vmul.f32 0.5, %v575_v26 }
 0x136   :  { %v461_v23 = vmul.f32 %v573_v20, %v454_v18 }
 0x137   :  { %v460_v24 = vmul.f32 %v459_v21, %v456_v22  ;;  %v458_v28 = vadd.f32 0.5, %v457_v27 }
 0x139   :  { %v462_v25 = vadd.f32 %v461_v23, %v460_v24 }
 0x13b   :  { %576 = vtanh.f32 %v462_v25  ;;  %466 = vst [vmem:[%s724_s7] sm:$0x3] %v462_v25 }
 0x145   :  { %v577_v29 = vpop.eup %576 }
 0x146   :  { %v464_v30 = vmul.f32 %v577_v29, %v458_v28 }
 0x148   :  { %465 = vst [vmem:[%s723_s6] sm:$0x3] %v464_v30 }
 0x149   :  { %475 = vsyncpa [#allocation3], 1 }
 0x14a   :  { %476 = vsyncpa [#allocation5], 1 }

</bundles_post_ra>
